<compile_context>
chip_gen: v7x
topology: tpu7x:2x2x1
jax: 0.10.0
libtpu: 0.0.40
codegen_flags: <defaults>
</compile_context>

<pallas_src>
import functools
import math

import jax
import jax.numpy as jnp
from jax import lax
from jax.experimental import pallas as pl
from jax.experimental.pallas import tpu as pltpu


@functools.lru_cache(maxsize=1)
def _vmem_limit():
    """Generation-aware VMEM cap: ~40 MiB on v7x (64 MiB phys), 96 MiB otherwise."""
    phys = 128 * 1024 * 1024
    try:
        info = pltpu.get_tpu_info()
        phys = int(getattr(info, "vmem_capacity_bytes", phys))
    except Exception:
        pass
    if phys <= 64 * 1024 * 1024:
        return 40 * 1024 * 1024
    return 96 * 1024 * 1024


def _compiler_params(sem):
    return pltpu.CompilerParams(dimension_semantics=sem,
                                vmem_limit_bytes=_vmem_limit())


def _pick_tile(dim, preferred, align):
    """Largest tile <= preferred that divides `dim` and is a multiple of `align`;
    falls back to the full dim (always a legal block extent)."""
    if dim <= preferred:
        return dim
    t = (preferred // align) * align
    while t >= align:
        if dim % t == 0:
            return t
        t -= align
    return dim


def _weight_spec(shape, index_map, buffers):
    """BlockSpec with optional deeper pipelining on a streamed weight."""
    if buffers > 2:
        try:
            return pl.BlockSpec(shape, index_map, pipeline_mode=pl.Buffered(buffers))
        except TypeError:
            pass  # older BlockSpec without pipeline_mode kwarg
    return pl.BlockSpec(shape, index_map)


# ----------------------------------------------------------------------------
# Kernels
# ----------------------------------------------------------------------------
def _mm_bias_kernel(x_ref, w_ref, b_ref, o_ref, acc_ref, *, activation):
    """Tiled o = act(x @ w + b); grid = (M tiles, N tiles, K tiles). bf16 MXU ops."""
    @pl.when(pl.program_id(2) == 0)
    def _():
        acc_ref[...] = jnp.zeros_like(acc_ref)

    acc_ref[...] += jnp.dot(x_ref[...].astype(jnp.bfloat16),
                            w_ref[...].astype(jnp.bfloat16),
                            preferred_element_type=jnp.float32)

    @pl.when(pl.program_id(2) == pl.num_programs(2) - 1)
    def _():
        y = acc_ref[...] + b_ref[...]
        if activation == "relu":
            y = jnp.maximum(y, 0.0)
        o_ref[...] = y.astype(o_ref.dtype)


def _ffn_ln_kernel(x_ref, w1_ref, b1_ref, w2_ref, b2_ref, g_ref, beta_ref,
                   o_ref, acc_ref):
    """o = LayerNorm(x + relu(x@w1+b1)@w2+b2); grid = (M tiles, Dh tiles).

    The 4D hidden activation never touches HBM; the Dh grid axis bounds the
    resident weight footprint (important on v7x's 64 MiB VMEM)."""
    k = pl.program_id(1)

    @pl.when(k == 0)
    def _():
        acc_ref[...] = jnp.zeros_like(acc_ref)

    x = x_ref[...]
    h = jnp.dot(x.astype(jnp.bfloat16), w1_ref[...],
                preferred_element_type=jnp.float32) + b1_ref[...]
    h = jnp.maximum(h, 0.0)
    acc_ref[...] += jnp.dot(h.astype(jnp.bfloat16), w2_ref[...],
                            preferred_element_type=jnp.float32)

    @pl.when(k == pl.num_programs(1) - 1)
    def _():
        y = acc_ref[...] + b2_ref[...] + x          # residual
        mean = jnp.mean(y, axis=-1, keepdims=True)
        var = jnp.mean(jnp.square(y - mean), axis=-1, keepdims=True)
        yn = (y - mean) * lax.rsqrt(var + 1e-5)
        o_ref[...] = (yn * g_ref[...] + beta_ref[...]).astype(o_ref.dtype)


def _attn_proj_ln_kernel(q_ref, kv_ref, res_ref, wo_ref, bo_ref, g_ref, beta_ref,
                         o_ref, attn_scratch, *, n_heads, q_off, k_off, v_off):
    """Fused MHA + output projection + residual add + LayerNorm.

    grid = (batch, Sq tiles). q_ref: (1, tq, Wq) bf16, kv_ref: (1, Sk, Wkv) bf16
    (heads are lane slices at static offsets; 1/sqrt(dh) already folded into the
    Q weights). Per-head outputs land in a VMEM scratch slab (no concatenate),
    then one full-contraction (tq,D)@(D,D) bf16 matmul, residual, LN."""
    q = q_ref[0]
    kv = kv_ref[0]
    D = o_ref.shape[-1]
    dh = D // n_heads

    for h in range(n_heads):
        qh = q[:, q_off + h * dh:q_off + (h + 1) * dh]
        kh = kv[:, k_off + h * dh:k_off + (h + 1) * dh]
        vh = kv[:, v_off + h * dh:v_off + (h + 1) * dh]
        s = lax.dot_general(qh, kh, (((1,), (1,)), ((), ())),
                            preferred_element_type=jnp.float32)        # (tq, Sk)
        s = s - jnp.max(s, axis=-1, keepdims=True)
        p = jnp.exp(s)
        p = p * pl.reciprocal(jnp.sum(p, axis=-1, keepdims=True), approx=True)
        attn_scratch[:, h * dh:(h + 1) * dh] = jnp.dot(
            p.astype(jnp.bfloat16), vh, preferred_element_type=jnp.float32)

    y = jnp.dot(attn_scratch[...].astype(jnp.bfloat16), wo_ref[...],
                preferred_element_type=jnp.float32)
    y = y + bo_ref[...] + res_ref[0]
    mean = jnp.mean(y, axis=-1, keepdims=True)
    var = jnp.mean(jnp.square(y - mean), axis=-1, keepdims=True)
    yn = (y - mean) * lax.rsqrt(var + 1e-5)
    o_ref[0] = (yn * g_ref[...] + beta_ref[...]).astype(o_ref.dtype)


def _softmax_kernel(x_ref, o_ref):
    x = x_ref[...].astype(jnp.float32)
    x = x - jnp.max(x, axis=-1, keepdims=True)
    e = jnp.exp(x)
    o_ref[...] = (e / jnp.sum(e, axis=-1, keepdims=True)).astype(o_ref.dtype)


# ----------------------------------------------------------------------------
# Kernel wrappers
# ----------------------------------------------------------------------------
def matmul_bias(x2d, w, b, activation="none", out_dtype=jnp.float32, w_buffers=2):
    M, K = x2d.shape
    Kw, N = w.shape
    assert K == Kw, (K, Kw)
    tm = _pick_tile(M, 256, 128)
    tn = _pick_tile(N, 256, 128)
    tk = _pick_tile(K, 512, 128)
    assert M % tm == 0 and N % tn == 0 and K % tk == 0, (M, N, K, tm, tn, tk)
    n_w_blocks = (N // tn) * (K // tk)
    buffers = w_buffers if n_w_blocks >= w_buffers else 2
    return pl.pallas_call(
        functools.partial(_mm_bias_kernel, activation=activation),
        out_shape=jax.ShapeDtypeStruct((M, N), out_dtype),
        grid_spec=pltpu.PrefetchScalarGridSpec(
            num_scalar_prefetch=0,
            grid=(M // tm, N // tn, K // tk),
            in_specs=[
                pl.BlockSpec((tm, tk), lambda i, j, k: (i, k)),
                _weight_spec((tk, tn), lambda i, j, k: (k, j), buffers),
                pl.BlockSpec((1, tn), lambda i, j, k: (0, j)),
            ],
            out_specs=pl.BlockSpec((tm, tn), lambda i, j, k: (i, j)),
            scratch_shapes=[pltpu.VMEM((tm, tn), jnp.float32)]),
        compiler_params=_compiler_params(("parallel", "parallel", "arbitrary")),
    )(x2d, w, b.reshape(1, N))


def ffn_block(x, p, ln_p):
    """x -> LayerNorm(x + FFN(x)), fused; Dh tiled on a grid axis."""
    B, S, D = x.shape
    Dh = p["w1"].shape[1]
    M = B * S
    tm = _pick_tile(M, 256, 128)
    tdh = _pick_tile(Dh, 512, 128)
    assert M % tm == 0 and Dh % tdh == 0
    out = pl.pallas_call(
        _ffn_ln_kernel,
        out_shape=jax.ShapeDtypeStruct((M, D), jnp.float32),
        grid_spec=pltpu.PrefetchScalarGridSpec(
            num_scalar_prefetch=0,
            grid=(M // tm, Dh // tdh),
            in_specs=[
                pl.BlockSpec((tm, D), lambda i, k: (i, 0)),
                pl.BlockSpec((D, tdh), lambda i, k: (0, k)),
                pl.BlockSpec((1, tdh), lambda i, k: (0, k)),
                pl.BlockSpec((tdh, D), lambda i, k: (k, 0)),
                pl.BlockSpec((1, D), lambda i, k: (0, 0)),
                pl.BlockSpec((1, D), lambda i, k: (0, 0)),
                pl.BlockSpec((1, D), lambda i, k: (0, 0)),
            ],
            out_specs=pl.BlockSpec((tm, D), lambda i, k: (i, 0)),
            scratch_shapes=[pltpu.VMEM((tm, D), jnp.float32)]),
        compiler_params=_compiler_params(("parallel", "arbitrary")),
    )(x.reshape(M, D), p["w1"], p["b1"].reshape(1, Dh), p["w2"],
      p["b2"].reshape(1, D), ln_p["g"].reshape(1, D), ln_p["b"].reshape(1, D))
    return out.reshape(B, S, D)


def _fused_attention(q_arr, kv_arr, residual, wo, bo, ln_p, *, n_heads,
                     q_off, k_off, v_off):
    """MHA + Wo + residual + LN, gridded over (batch, Sq tiles)."""
    B, Sq, Wq = q_arr.shape
    _, Sk, Wkv = kv_arr.shape
    D = residual.shape[-1]
    tq = _pick_tile(Sq, 256, 128)
    assert Sq % tq == 0
    return pl.pallas_call(
        functools.partial(_attn_proj_ln_kernel, n_heads=n_heads,
                          q_off=q_off, k_off=k_off, v_off=v_off),
        out_shape=jax.ShapeDtypeStruct((B, Sq, D), jnp.float32),
        grid_spec=pltpu.PrefetchScalarGridSpec(
            num_scalar_prefetch=0,
            grid=(B, Sq // tq),
            in_specs=[
                pl.BlockSpec((1, tq, Wq), lambda b, i: (b, i, 0)),
                pl.BlockSpec((1, Sk, Wkv), lambda b, i: (b, 0, 0)),
                pl.BlockSpec((1, tq, D), lambda b, i: (b, i, 0)),
                pl.BlockSpec((D, D), lambda b, i: (0, 0)),
                pl.BlockSpec((1, D), lambda b, i: (0, 0)),
                pl.BlockSpec((1, D), lambda b, i: (0, 0)),
                pl.BlockSpec((1, D), lambda b, i: (0, 0)),
            ],
            out_specs=pl.BlockSpec((1, tq, D), lambda b, i: (b, i, 0)),
            scratch_shapes=[pltpu.VMEM((tq, D), jnp.float32)]),
        compiler_params=_compiler_params(("parallel", "parallel")),
    )(q_arr, kv_arr, residual, wo, bo.reshape(1, D),
      ln_p["g"].reshape(1, D), ln_p["b"].reshape(1, D))


def self_attention_block(x, p, ln_p, n_heads):
    """x -> LayerNorm(x + MHA(x,x,x) @ Wo + bo); fused QKV projection (bf16 out)."""
    B, S, D = x.shape
    x2d = x.reshape(B * S, D)
    qkv = matmul_bias(x2d, p["w_qkv"], p["b_qkv"],
                      out_dtype=jnp.bfloat16).reshape(B, S, 3 * D)
    # qkv passed twice: once Sq-tiled for the query rows, once full for K/V.
    return _fused_attention(qkv, qkv, x, p["wo"], p["bo"], ln_p,
                            n_heads=n_heads, q_off=0, k_off=D, v_off=2 * D)


def cross_attention_block(y, enc_out, p, ln_p, n_heads):
    """y -> LayerNorm(y + MHA(y, enc, enc) @ Wo + bo); fused KV projection."""
    B, Sq, D = y.shape
    Sk = enc_out.shape[1]
    y2d = y.reshape(B * Sq, D)
    q = matmul_bias(y2d, p["wq"], p["bq"],
                    out_dtype=jnp.bfloat16).reshape(B, Sq, D)
    kv = matmul_bias(enc_out.reshape(B * Sk, D), p["w_kv"], p["b_kv"],
                     out_dtype=jnp.bfloat16).reshape(B, Sk, 2 * D)
    return _fused_attention(q, kv, y, p["wo"], p["bo"], ln_p,
                            n_heads=n_heads, q_off=0, k_off=0, v_off=D)


def softmax_rows(x2d):
    M, N = x2d.shape
    in_bytes = jnp.dtype(x2d.dtype).itemsize
    # VMEM-budget the row tile against the (full) vocab width: double-buffered
    # input + output blocks must stay well under the limit.
    budget = max(4 * 1024 * 1024, _vmem_limit() // 4)
    per_row = 2 * N * (in_bytes + 4)
    tm_cap = max(8, (budget // per_row) // 8 * 8)
    tm = _pick_tile(M, min(512, tm_cap), 8)
    assert M % tm == 0
    return pl.pallas_call(
        _softmax_kernel,
        out_shape=jax.ShapeDtypeStruct((M, N), jnp.float32),
        grid=(M // tm,),
        in_specs=[pl.BlockSpec((tm, N), lambda i: (i, 0))],
        out_specs=pl.BlockSpec((tm, N), lambda i: (i, 0)),
        compiler_params=_compiler_params(("parallel",)),
    )(x2d)


# ----------------------------------------------------------------------------
# Model (parameter init + forward)
# ----------------------------------------------------------------------------
def positional_encoding(seq_len, d):
    # Assumes even d (true for all standard configs).
    pos = jnp.arange(seq_len, dtype=jnp.float32)[:, None]
    i = jnp.arange(0, d, 2, dtype=jnp.float32)
    ang = pos / jnp.power(10000.0, i / d)
    pe = jnp.zeros((seq_len, d), jnp.float32)
    pe = pe.at[:, 0::2].set(jnp.sin(ang))
    pe = pe.at[:, 1::2].set(jnp.cos(ang))
    return pe


def init_transformer(key, embed_dim, src_vocab, trg_vocab, num_layers, expansion, n_heads):
    kit = iter(jax.random.split(key, 8 + num_layers * 32))
    scale = 1.0 / math.sqrt(embed_dim // n_heads)

    def rnd(shape):
        return jax.random.normal(next(kit), shape, jnp.float32) * 0.02

    def bf16(w):
        return w.astype(jnp.bfloat16)

    def self_attn_params():
        w_qkv = rnd((embed_dim, 3 * embed_dim))
        # Fold 1/sqrt(head_dim) into the Q projection (columns [:D]).
        w_qkv = w_qkv.at[:, :embed_dim].multiply(scale)
        return {"w_qkv": bf16(w_qkv),
                "b_qkv": jnp.zeros((3 * embed_dim,), jnp.float32),
                "wo": bf16(rnd((embed_dim, embed_dim))),
                "bo": jnp.zeros((embed_dim,), jnp.float32)}

    def cross_attn_params():
        wq = rnd((embed_dim, embed_dim)) * scale   # scale folded into Q weights
        return {"wq": bf16(wq),
                "bq": jnp.zeros((embed_dim,), jnp.float32),
                "w_kv": bf16(rnd((embed_dim, 2 * embed_dim))),
                "b_kv": jnp.zeros((2 * embed_dim,), jnp.float32),
                "wo": bf16(rnd((embed_dim, embed_dim))),
                "bo": jnp.zeros((embed_dim,), jnp.float32)}

    def ln_params():
        return {"g": jnp.ones((embed_dim,), jnp.float32),
                "b": jnp.zeros((embed_dim,), jnp.float32)}

    def ffn_params():
        dh = expansion * embed_dim
        return {"w1": bf16(rnd((embed_dim, dh))),
                "b1": jnp.zeros((dh,), jnp.float32),
                "w2": bf16(rnd((dh, embed_dim))),
                "b2": jnp.zeros((embed_dim,), jnp.float32)}

    params = {
        "src_emb": rnd((src_vocab, embed_dim)),
        "trg_emb": rnd((trg_vocab, embed_dim)),
        "fc_out": {"w": bf16(rnd((embed_dim, trg_vocab))),
                   "b": jnp.zeros((trg_vocab,), jnp.float32)},
        "enc_layers": [],
        "dec_layers": [],
        "n_heads": n_heads,
        "embed_dim": embed_dim,
    }
    for _ in range(num_layers):
        params["enc_layers"].append({"attn": self_attn_params(), "ln1": ln_params(),
                                     "ffn": ffn_params(), "ln2": ln_params()})
        params["dec_layers"].append({"self_attn": self_attn_params(), "ln1": ln_params(),
                                     "cross_attn": cross_attn_params(), "ln2": ln_params(),
                                     "ffn": ffn_params(), "ln3": ln_params()})
    return params


def transformer_forward(params, src_ids, trg_ids):
    D = params["embed_dim"]
    H = params["n_heads"]

    # TODO(synk): token-embedding gather + PE add kept in plain JAX (data-dependent
    #             gather has no rectangular BlockSpec; a DMA-gather kernel is overkill here).
    x = jnp.take(params["src_emb"], src_ids, axis=0) * math.sqrt(D)
    x = x + positional_encoding(src_ids.shape[1], D)[None, :, :]
    for lp in params["enc_layers"]:
        x = self_attention_block(x, lp["attn"], lp["ln1"], H)
        x = ffn_block(x, lp["ffn"], lp["ln2"])
    enc_out = x

    y = jnp.take(params["trg_emb"], trg_ids, axis=0) * math.sqrt(D)
    y = y + positional_encoding(trg_ids.shape[1], D)[None, :, :]
    for lp in params["dec_layers"]:
        y = self_attention_block(y, lp["self_attn"], lp["ln1"], H)
        y = cross_attention_block(y, enc_out, lp["cross_attn"], lp["ln2"], H)
        y = ffn_block(y, lp["ffn"], lp["ln3"])

    B, St, _ = y.shape
    V = params["fc_out"]["w"].shape[1]
    # Logits emitted bf16 (halves the logits HBM write/read); softmax stats f32.
    logits = matmul_bias(y.reshape(B * St, D), params["fc_out"]["w"],
                         params["fc_out"]["b"], out_dtype=jnp.bfloat16, w_buffers=3)
    probs = softmax_rows(logits)
    return probs.reshape(B, St, V)


# ----------------------------------------------------------------------------
if __name__ == "__main__":
    # Small, deterministic configuration.
    embed_dim = 32
    src_vocab_size = 16
    target_vocab_size = 16
    src_seq_length = 8
    trg_seq_length = 8
    num_layers = 2
    expansion_factor = 4
    n_heads = 4          # head_dim = 8

    batch = 2

    root = jax.random.PRNGKey(0)
    k_param, k_src, k_trg = jax.random.split(root, 3)

    params = init_transformer(k_param, embed_dim, src_vocab_size, target_vocab_size,
                              num_layers, expansion_factor, n_heads)

    src = jax.random.randint(k_src, (batch, src_seq_length), 0, src_vocab_size, jnp.int32)
    trg = jax.random.randint(k_trg, (batch, trg_seq_length), 0, target_vocab_size, jnp.int32)

    out = transformer_forward(params, src, trg)
    out = jax.block_until_ready(out)

    assert out.shape == (batch, trg_seq_length, target_vocab_size), out.shape
    # softmax rows should sum to ~1
    assert jnp.allclose(jnp.sum(out, axis=-1), 1.0, atol=1e-3)
    print("KERNEL_OK")
</pallas_src>

<mosaic_0001>
module attributes {stable_mosaic.version = 11 : i64} {
  func.func @_mm_bias_kernel(%arg0: i32, %arg1: i32, %arg2: i32, %arg3: memref<16x32xf32, #tpu.memory_space<vmem>>, %arg4: memref<32x96xbf16, #tpu.memory_space<vmem>>, %arg5: memref<1x96xf32, #tpu.memory_space<vmem>>, %arg6: memref<16x96xbf16, #tpu.memory_space<vmem>>, %arg7: memref<16x96xf32, #tpu.memory_space<vmem>>) attributes {dimension_semantics = [#tpu.dimension_semantics<parallel>, #tpu.dimension_semantics<parallel>, #tpu.dimension_semantics<arbitrary>], iteration_bounds = array<i64: 1, 1, 1>, scalar_prefetch = 0 : i64, scratch_operands = 1 : i64, tpu.core_type = #tpu.core_type<tc>, window_params = [{transform_indices = @transform_0, window_bounds = array<i64: 16, 32>}, {transform_indices = @transform_1, window_bounds = array<i64: 32, 96>}, {transform_indices = @transform_2, window_bounds = array<i64: 1, 96>}, {transform_indices = @transform_3, window_bounds = array<i64: 16, 96>}]} {
    %c0_i32 = arith.constant 0 : i32
    %0 = arith.cmpi eq, %arg2, %c0_i32 : i32
    %1 = arith.extui %0 : i1 to i32
    %c0_i32_0 = arith.constant 0 : i32
    %2 = arith.cmpi ne, %1, %c0_i32_0 : i32
    scf.if %2 {
      %cst_10 = arith.constant 0.000000e+00 : f32
      %13 = vector.broadcast %cst_10 : f32 to vector<16x96xf32>
      %c0_11 = arith.constant 0 : index
      %c0_12 = arith.constant 0 : index
      %14 = vector.load %arg7[%c0_11, %c0_12] : memref<16x96xf32, #tpu.memory_space<vmem>>, vector<16x96xf32>
      tpu.vector_store %arg7[%c0_11, %c0_12], %13 {strides = array<i32>} : memref<16x96xf32, #tpu.memory_space<vmem>>, vector<16x96xf32>,
    } else {
    }
    %c0 = arith.constant 0 : index
    %c0_1 = arith.constant 0 : index
    %3 = vector.load %arg7[%c0, %c0_1] : memref<16x96xf32, #tpu.memory_space<vmem>>, vector<16x96xf32>
    %c0_2 = arith.constant 0 : index
    %c0_3 = arith.constant 0 : index
    %4 = vector.load %arg3[%c0_2, %c0_3] : memref<16x32xf32, #tpu.memory_space<vmem>>, vector<16x32xf32>
    %5 = arith.truncf %4 : vector<16x32xf32> to vector<16x32xbf16>
    %c0_4 = arith.constant 0 : index
    %c0_5 = arith.constant 0 : index
    %6 = vector.load %arg4[%c0_4, %c0_5] : memref<32x96xbf16, #tpu.memory_space<vmem>>, vector<32x96xbf16>
    %cst = arith.constant dense<0.000000e+00> : vector<16x96xf32>
    %7 = tpu.matmul %5, %6, %cst {dimension_numbers = #tpu.dot_dimension_numbers<[1], [0], [0], [1], [0, 0, 1, 1], [], []>} : vector<16x32xbf16>, vector<32x96xbf16>, vector<16x96xf32> -> vector<16x96xf32>
    %8 = arith.addf %3, %7 : vector<16x96xf32>
    %c0_6 = arith.constant 0 : index
    %c0_7 = arith.constant 0 : index
    %9 = vector.load %arg7[%c0_6, %c0_7] : memref<16x96xf32, #tpu.memory_space<vmem>>, vector<16x96xf32>
    tpu.vector_store %arg7[%c0_6, %c0_7], %8 {strides = array<i32>} : memref<16x96xf32, #tpu.memory_space<vmem>>, vector<16x96xf32>,
    %c0_i32_8 = arith.constant 0 : i32
    %10 = arith.cmpi eq, %arg2, %c0_i32_8 : i32
    %11 = arith.extui %10 : i1 to i32
    %c0_i32_9 = arith.constant 0 : i32
    %12 = arith.cmpi ne, %11, %c0_i32_9 : i32
    scf.if %12 {
      %c0_10 = arith.constant 0 : index
      %c0_11 = arith.constant 0 : index
      %13 = vector.load %arg7[%c0_10, %c0_11] : memref<16x96xf32, #tpu.memory_space<vmem>>, vector<16x96xf32>
      %c0_12 = arith.constant 0 : index
      %c0_13 = arith.constant 0 : index
      %14 = vector.load %arg5[%c0_12, %c0_13] : memref<1x96xf32, #tpu.memory_space<vmem>>, vector<1x96xf32>
      %15 = vector.broadcast %14 : vector<1x96xf32> to vector<16x96xf32>
      %16 = arith.addf %13, %15 : vector<16x96xf32>
      %17 = arith.truncf %16 : vector<16x96xf32> to vector<16x96xbf16>
      %c0_14 = arith.constant 0 : index
      %c0_15 = arith.constant 0 : index
      %18 = vector.load %arg6[%c0_14, %c0_15] : memref<16x96xbf16, #tpu.memory_space<vmem>>, vector<16x96xbf16>
      tpu.vector_store %arg6[%c0_14, %c0_15], %17 {strides = array<i32>} : memref<16x96xbf16, #tpu.memory_space<vmem>>, vector<16x96xbf16>,
    } else {
    }
    return
  }
  func.func @transform_0(%arg0: i32, %arg1: i32, %arg2: i32) -> (i32, i32) {
    %c0_i32 = arith.constant 0 : i32
    return %arg0, %arg2 : i32, i32
  }
  func.func @transform_1(%arg0: i32, %arg1: i32, %arg2: i32) -> (i32, i32) {
    %c0_i32 = arith.constant 0 : i32
    return %arg2, %arg1 : i32, i32
  }
  func.func @transform_2(%arg0: i32, %arg1: i32, %arg2: i32) -> (i32, i32) {
    %c0_i32 = arith.constant 0 : i32
    %c0_i32_0 = arith.constant 0 : i32
    return %c0_i32, %arg1 : i32, i32
  }
  func.func @transform_3(%arg0: i32, %arg1: i32, %arg2: i32) -> (i32, i32) {
    %c0_i32 = arith.constant 0 : i32
    return %arg0, %arg1 : i32, i32
  }
}

</mosaic_0001>

<bundles_post_ra>
// kernel: tpu_custom_call.1
= control target key start
LH: loop header
LB: loop body
LE: loop exit
PB: predicated region body
PF: predicated region fallthrough
CT: control target
= control target key end

     0   :  { %8 = vsyncpa [#allocation4], 0  ;;  %s389_s0 = inlined_call_operand.hbm [shape: f32[16,32], index: 0, kind: input, shape index: {}]   ;;  %s390_s1 = inlined_call_operand.hbm [shape: bf16[32,96], index: 1, kind: input, shape index: {}]   ;;  %s391_s2 = inlined_call_operand.hbm [shape: f32[1,96], index: 2, kind: input, shape index: {}]   ;;  %s392_s3 = inlined_call_operand.hbm [shape: bf16[16,96], index: 3, kind: output, shape index: {}]  }
   0x1   :  { %9 = vsyncpa [#allocation7], 0 }
   0x2   :  { %10 = vsyncpa [#allocation5], 0  ;;  %s301_s12 = smov [#allocation6]   ;;  %s207_s16 = scalar_lea.hbm %s390_s1, 256 }
   0x3   :  { %s28_s13 = sshll.u32 %s301_s12, 4  ;;  %p208_p0 = scmp.ne.s32.totalorder %s390_s1, %s207_s16  ;;  %s29_s13 = int_to_ptr.vmem [resolvable:$true] %s28_s13 }
   0x4   :  { %p211_p1 = scmp.lt.u32.totalorder %s207_s16, %s390_s1 }
   0x6   :  { %p213_p2 = pnand %p211_p1, %p208_p0 }
   0x8   :  { %216 = shalt.err (!%p213_p2)
}
   0x9   :  { %s217_s21 = scalar_lea.vmem %s29_s13, 256  ;;  %p222_p4 = scmp.lt.s32.totalorder %s29_s13, %s29_s13 }
   0xa   :  { %p218_p3 = scmp.ne.s32.totalorder %s29_s13, %s217_s21  ;;  %p223_p5 = scmp.lt.s32.totalorder %s217_s21, %s217_s21 }
   0xc   :  { %p224_p6 = por %p223_p5, %p222_p4 }
   0xe   :  { %p225_p7 = pnand %p224_p6, %p218_p3 }
  0x10   :  { %228 = shalt.err (!%p225_p7)
}
  0x11   :  { %s302_s22 = smov 64   ;;  %s303_s23 = smov 4  }
  0x12   :  { %34 = dma.hbm_to_vmem [thread:$0]  %s390_s1, 256, %s29_s13, [#allocation7], %s302_s22, %s302_s22, %s303_s23  }
  0x13   :  { %s304_s26 = smov [#allocation3]   ;;  %s229_s30 = scalar_lea.hbm %s389_s0, 256 }
  0x14   :  { %s16_s27 = sshll.u32 %s304_s26, 4  ;;  %p230_p8 = scmp.ne.s32.totalorder %s389_s0, %s229_s30  ;;  %s17_s27 = int_to_ptr.vmem [resolvable:$true] %s16_s27 }
  0x15   :  { %p233_p9 = scmp.lt.u32.totalorder %s229_s30, %s389_s0 }
  0x17   :  { %p235_p10 = pnand %p233_p9, %p230_p8 }
  0x19   :  { %238 = shalt.err (!%p235_p10)
}
  0x1a   :  { %s239_s8 = scalar_lea.vmem %s17_s27, 256  ;;  %p244_p12 = scmp.lt.s32.totalorder %s17_s27, %s17_s27 }
  0x1b   :  { %p240_p11 = scmp.ne.s32.totalorder %s17_s27, %s239_s8  ;;  %p245_p13 = scmp.lt.s32.totalorder %s239_s8, %s239_s8 }
  0x1d   :  { %p246_p0 = por %p245_p13, %p244_p12 }
  0x1f   :  { %p247_p1 = pnand %p246_p0, %p240_p11 }
  0x21   :  { %250 = shalt.err (!%p247_p1)
}
  0x22   :  { %s305_s1 = smov 128   ;;  %s306_s9 = smov 8  }
  0x23   :  { %22 = dma.hbm_to_vmem [thread:$0]  %s389_s0, 256, %s17_s27, [#allocation4], %s305_s1, %s305_s1, %s306_s9  }
  0x24   :  { %s307_s12 = smov [#allocation8]   ;;  %s251_s16 = scalar_lea.hbm %s391_s2, 16 }
  0x25   :  { %s41_s13 = sshll.u32 %s307_s12, 4  ;;  %p252_p2 = scmp.ne.s32.totalorder %s391_s2, %s251_s16  ;;  %s42_s13 = int_to_ptr.vmem [resolvable:$true] %s41_s13 }
  0x26   :  { %p255_p3 = scmp.lt.u32.totalorder %s251_s16, %s391_s2 }
  0x28   :  { %p257_p4 = pnand %p255_p3, %p252_p2 }
  0x2a   :  { %260 = shalt.err (!%p257_p4)
}
  0x2b   :  { %s261_s21 = scalar_lea.vmem %s42_s13, 16  ;;  %s265_s0 = scalar_lea.vmem %s42_s13, 32 }
  0x2c   :  { %p262_p5 = scmp.ne.s32.totalorder %s42_s13, %s261_s21  ;;  %p266_p6 = scmp.lt.s32.totalorder %s42_s13, %s42_s13 }
  0x2d   :  { %p267_p7 = scmp.lt.s32.totalorder %s265_s0, %s261_s21 }
  0x2f   :  { %p268_p8 = por %p267_p7, %p266_p6 }
  0x31   :  { %p269_p9 = pnand %p268_p8, %p262_p5 }
  0x33   :  { %272 = shalt.err (!%p269_p9)
}
  0x34   :  { %44 = dma.hbm_to_vmem [thread:$0]  %s391_s2, 16, %s42_s13, [#allocation7]  }
  0x35   :  { %295 = dma.done.wait [#allocation4], 256  }
  0x36   :  { %296 = vsyncadd [#allocation4], 4294967040 }
  0x37   :  { %297 = dma.done.wait [#allocation7], 272  }
  0x38   :  { %298 = vsyncadd [#allocation7], 4294967024  ;;  %vm59_vm0 = vcmask 785408   ;;  %v308_v0 = vmov 0.0   ;;  %vm309_vm1 = vmmov 0   ;;  %v205_v1 = vld [vmem:[#allocation6] sm:$0xff]  }
  0x39   :  { %60 = vst.msk [vmem:[#allocation2] sm:$0xff] %vm59_vm0, %v308_v0  ;;  %61 = vst.msk [vmem:[#allocation2 + $0x8] sm:$0xff] %vm59_vm0, %v308_v0  ;;  %187 = vmatprep.subr.bf16.mxu0 %v308_v0  ;;  %191 = vmatprep.mubr.msk.bf16.mxu0 %vm309_vm1, %v308_v0  ;;  %v206_v2 = vld [vmem:[#allocation6 + $0x8] sm:$0xff]   ;;  %v64_v3 = vld [vmem:[#allocation3] sm:$0xff]  ;;  %vm83_vm2 = vcmask 261120   ;;  %vm155_vm3 = vcmask 781312  }
  0x3a   :  { %188 = vmatpush3.bf16.msra.mxu0 %v205_v1  ;;  %v65_v4 = vld [vmem:[#allocation3 + $0x8] sm:$0xff]  ;;  %v179_v14 = vld [vmem:[#allocation8] ss:$0 sm:$0xff]  ;;  %s310_s2 = smov [#allocation9]  }
  0x3b   :  { %189 = vmatprep.subr.bf16.mxu0 %v308_v0  ;;  %v66_v5 = vpack.c.bf16 %v65_v4, %v64_v3  ;;  %s163_s26 = sshll.u32 %s310_s2, 4  ;;  %s164_s26 = int_to_ptr.vmem [resolvable:$true] %s163_s26 }
  0x3c   :  { %s273_s27 = scalar_lea.vmem %s164_s26, 128  ;;  %p278_p11 = scmp.lt.s32.totalorder %s164_s26, %s164_s26 }
  0x3d   :  { %p274_p10 = scmp.ne.s32.totalorder %s164_s26, %s273_s27  ;;  %p279_p12 = scmp.lt.s32.totalorder %s273_s27, %s273_s27 }
  0x3e   :  { %190 = vmatpush3.bf16.msra.mxu0 %v206_v2 }
  0x3f   :  { %p280_p13 = por %p279_p12, %p278_p11 }
  0x40   :  { %v62_v6 = vld [vmem:[#allocation2] sm:$0xff]  ;;  %v63_v8 = vld [vmem:[#allocation2 + $0x8] sm:$0xff] }
  0x41   :  { %192 = vmatmul.mubr.msk.bf16.vlgmr.msra.gmra.mrb[0].mxu0 %vm83_vm2, %v66_v5  ;;  %p281_p0 = pnand %p280_p13, %p274_p10 }
 0x114   :  { %v121_v7 = vpop.f32.mrb[0].mxu0 }
 0x115   :  { %v128_v9 = vadd.f32 %v121_v7, %v62_v6  ;;  %v193_v10 = vpop.f32.mrb[1].mxu0 }
 0x116   :  { %v124_v11 = vpop.f32.mrb[2].mxu0 }
 0x117   :  { %131 = vst.msk [vmem:[#allocation2] sm:$0xff] %vm59_vm0, %v128_v9  ;;  %v129_v12 = vadd.f32 %v124_v11, %v63_v8  ;;  %v194_v13 = vpop.f32.mrb[3].mxu0 }
 0x119   :  { %132 = vst.msk [vmem:[#allocation2 + $0x8] sm:$0xff] %vm59_vm0, %v129_v12 }
 0x11e   :  { %v136_v15 = vld [vmem:[#allocation2] sm:$0xff] }
 0x11f   :  { %v145_v16 = vadd.f32 %v179_v14, %v136_v15 }
 0x120   :  { %v137_v17 = vld [vmem:[#allocation2 + $0x8] sm:$0xff] }
 0x121   :  { %v146_v18 = vadd.f32 %v179_v14, %v137_v17  ;;  %v182_v19 = vpack.c.bf16 %v145_v16, %v145_v16 }
 0x123   :  { %v183_v20 = vpack.c.bf16 %v146_v18, %v146_v18  ;;  %156 = vst.msk [vmem:[#allocation9] sm:$0xf] %vm155_vm3, %v182_v19 }
 0x125   :  { %157 = vst.msk [vmem:[#allocation9 + $0x4] sm:$0xf] %vm155_vm3, %v183_v20 }
 0x126   :  { %284 = shalt.err (!%p281_p0)
}
 0x127   :  { %s285_s30 = scalar_lea.hbm %s392_s3, 128 }
 0x128   :  { %p286_p1 = scmp.ne.s32.totalorder %s392_s3, %s285_s30  ;;  %p289_p2 = scmp.lt.u32.totalorder %s285_s30, %s392_s3 }
 0x12a   :  { %p291_p3 = pnand %p289_p2, %p286_p1 }
 0x12c   :  { %294 = shalt.err (!%p291_p3)
}
 0x12d   :  { %169 = dma.vmem_to_hbm [thread:$0]  %s164_s26, 128, %s392_s3, [#allocation5], %s302_s22, %s302_s22, %s303_s23  }
 0x12e   :  { %299 = dma.done.wait [#allocation5], 128  }
 0x12f   :  { %300 = vsyncadd [#allocation5], 4294967168 }
 0x130   :  { %173 = vsyncpa [#allocation4], 1 }
 0x131   :  { %174 = vsyncpa [#allocation7], 1 }
 0x132   :  { %175 = vsyncpa [#allocation5], 1 }

</bundles_post_ra>
